<compile_context>
chip_gen: v7x
topology: tpu7x:2x2x1
jax: 0.10.0
libtpu: 0.0.40
codegen_flags: <defaults>
</compile_context>

<pallas_src>
import jax
import jax.numpy as jnp
import numpy as np
from jax.experimental import pallas as pl
from jax.experimental.pallas import tpu as pltpu

EPS = 1e-6  # module default


def _default_vmem_limit():
    # Generation-aware scoped-VMEM limit: ~75% of physical capacity
    # (v5e/v6e: 128 MiB -> 96 MiB; v7x: 64 MiB -> 48 MiB), with a safe floor
    # and ceiling.
    try:
        cap = int(pltpu.get_tpu_info().vmem_capacity_bytes)
    except Exception:
        cap = 64 * 1024 * 1024  # conservative (v7x-sized) fallback
    return max(16 * 1024 * 1024, min(cap * 3 // 4, 100 * 1024 * 1024))


# ----------------------------------------------------------------------------
# Kernel 1: conditioning path  (SiLU -> Linear), column-tiled over 6C
# ----------------------------------------------------------------------------
def _adaln_cond_kernel(c_ref, w_ref, b_ref, mod_ref):
    # c: (B, C)   w block: (C, tc)   b block: (1, tc)   mod block: (B, tc)
    c = c_ref[...].astype(jnp.float32)
    s = c * jax.nn.sigmoid(c)  # SiLU (sigmoid -> EUP)
    mod_ref[...] = (
        jnp.dot(s, w_ref[...].astype(jnp.float32),
                preferred_element_type=jnp.float32)
        + b_ref[...].astype(jnp.float32)
    ).astype(mod_ref.dtype)


def adaln_cond_pallas(c, w_mod, b_mod, *, vmem_limit=None):
    """c: [B, C], w_mod: [C, 6C] (pre-transposed), b_mod: [6C] -> mod [B, 6C]."""
    B, C = c.shape
    H6 = w_mod.shape[1]
    if vmem_limit is None:
        vmem_limit = _default_vmem_limit()

    # Column tile over the 6C output axis: the big weight is never fully
    # VMEM-resident (<= ~8 MiB per block at C=2048), and its DMA overlaps the
    # matmul via the auto-pipeline.  Ragged tail handled by Pallas.
    tc = H6 if H6 <= 1024 else 1024
    grid = (pl.cdiv(H6, tc),)

    return pl.pallas_call(
        _adaln_cond_kernel,
        out_shape=jax.ShapeDtypeStruct((B, H6), jnp.float32),
        grid_spec=pltpu.PrefetchScalarGridSpec(
            num_scalar_prefetch=0,
            grid=grid,
            in_specs=[
                pl.BlockSpec((B, C), lambda j: (0, 0)),    # c (revisited, no re-DMA)
                pl.BlockSpec((C, tc), lambda j: (0, j)),   # weight column block
                pl.BlockSpec((1, tc), lambda j: (0, j)),   # bias column block
            ],
            out_specs=pl.BlockSpec((B, tc), lambda j: (0, j)),
        ),
        compiler_params=pltpu.CompilerParams(
            dimension_semantics=("parallel",),
            vmem_limit_bytes=vmem_limit,
        ),
        cost_estimate=pl.CostEstimate(
            flops=2 * int(B) * int(C) * int(H6),
            transcendentals=int(B) * int(C),
            bytes_accessed=4 * (int(C) * int(H6) + int(B) * (int(C) + int(H6))
                               + int(H6)),
        ),
    )(c, w_mod, b_mod.reshape(1, H6))


# ----------------------------------------------------------------------------
# Kernel 2: LayerNorm + adaptive modulation (hot path, token-tiled, no pad)
# ----------------------------------------------------------------------------
def _adaln_apply_kernel(scale_ref, shift_ref, x_ref, o_ref):
    # scale/shift: (1, 1, C) f32   x/o: (1, tn, C) in I/O dtype (f32 or bf16)
    x = x_ref[0].astype(jnp.float32)                       # (tn, C)
    mean = jnp.mean(x, axis=-1, keepdims=True)
    xc = x - mean
    # Two-pass (centered) variance — extra ops hidden under HBM-bound pipeline.
    var = jnp.mean(xc * xc, axis=-1, keepdims=True)
    xn = xc * jax.lax.rsqrt(var + EPS)                     # rsqrt -> EUP slot
    o_ref[0] = (xn * scale_ref[0] + shift_ref[0]).astype(o_ref.dtype)


def adaln_apply_pallas(x, eff_scale, eff_shift, *, tn=1024, vmem_limit=None):
    """x: [B, N, C] (f32 or bf16), eff_scale/eff_shift: [B, C] -> [B, N, C].

    Note: the feature dim C should ideally be a multiple of 128 (real DiT
    widths are); smaller / unaligned C still works (full-extent last block)
    but pays masked partial stores.
    """
    B, N, C = x.shape
    if vmem_limit is None:
        vmem_limit = _default_vmem_limit()

    # Token tile: as big as the VMEM budget allows (per-step pipeline overhead
    # is fixed, so bigger tiles get closer to the HBM roofline, esp. on v7x).
    # Budget: double-buffered (in + out) tiles <= ~60% of the scoped limit.
    itemsize = jnp.dtype(x.dtype).itemsize
    bytes_per_token_row = 2 * 2 * C * itemsize
    max_rows = max(8, (int(vmem_limit * 0.6) // bytes_per_token_row) // 8 * 8)
    tn_eff = max(8, min(tn, max_rows) // 8 * 8)
    if tn_eff >= N:
        tn_eff = N                      # single full-extent block (any N legal)
    nt = pl.cdiv(N, tn_eff)             # ragged tail: padded reads / dropped
                                        # writes, no jnp.pad or output slice

    es3 = eff_scale.reshape(B, 1, C).astype(jnp.float32)
    eh3 = eff_shift.reshape(B, 1, C).astype(jnp.float32)

    # Single flattened parallel grid axis -> even megacore split (v7x).
    grid = (B * nt,)

    return pl.pallas_call(
        _adaln_apply_kernel,
        out_shape=jax.ShapeDtypeStruct((B, N, C), x.dtype),
        grid_spec=pltpu.PrefetchScalarGridSpec(
            num_scalar_prefetch=0,
            grid=grid,
            in_specs=[
                pl.BlockSpec((1, 1, C), lambda i: (i // nt, 0, 0)),       # eff_scale
                pl.BlockSpec((1, 1, C), lambda i: (i // nt, 0, 0)),       # eff_shift
                pl.BlockSpec((1, tn_eff, C), lambda i: (i // nt, i % nt, 0)),  # x
            ],
            out_specs=pl.BlockSpec((1, tn_eff, C), lambda i: (i // nt, i % nt, 0)),
        ),
        compiler_params=pltpu.CompilerParams(
            dimension_semantics=("parallel",),
            vmem_limit_bytes=vmem_limit,
        ),
        cost_estimate=pl.CostEstimate(
            flops=int(B) * int(N) * 10 * int(C),
            transcendentals=int(B) * int(N),
            bytes_accessed=2 * int(B) * int(N) * int(C) * itemsize
                           + 8 * int(B) * int(C),
        ),
    )(es3, eh3, x)


# ----------------------------------------------------------------------------
# Module wrapper (parameter container + forward)
# ----------------------------------------------------------------------------
def init_params(dim):
    # Faithful to the PyTorch module: gamma=1, beta=0, zero-init modulation
    # Linear.  w_mod is stored pre-transposed as [dim, 6*dim].
    return {
        "gamma": jnp.ones((dim,), jnp.float32),
        "beta": jnp.zeros((dim,), jnp.float32),
        "w_mod": jnp.zeros((dim, 6 * dim), jnp.float32),
        "b_mod": jnp.zeros((6 * dim,), jnp.float32),
    }


def adaln_zero_forward(params, x, c, *, tn=1024):
    """x: [B, N, C] (f32 or bf16), c: [B, C].
    Returns (x_mod [B, N, C], (shift_ffn, scale_ffn, gate_mha, gate_ffn))."""
    B, N, C = x.shape

    mod = adaln_cond_pallas(c, params["w_mod"], params["b_mod"])

    # chunk(6, dim=-1): shift_mha, scale_mha, gate_mha, shift_ffn, scale_ffn, gate_ffn
    shift_mha = mod[:, 0:C]
    scale_mha = mod[:, C:2 * C]
    gate_mha = mod[:, 2 * C:3 * C]
    shift_ffn = mod[:, 3 * C:4 * C]
    scale_ffn = mod[:, 4 * C:5 * C]
    gate_ffn = mod[:, 5 * C:6 * C]

    # Fold gamma/beta/(1+scale)/shift into per-batch effective rows (B x C,
    # microscopic -> plain jnp per review):
    #   (x_norm*gamma + beta)*(1+scale) + shift
    # = x_norm * [gamma*(1+scale)] + [beta*(1+scale) + shift]
    one_plus = 1.0 + scale_mha
    eff_scale = params["gamma"][None, :] * one_plus
    eff_shift = params["beta"][None, :] * one_plus + shift_mha

    x_mod = adaln_apply_pallas(x, eff_scale, eff_shift, tn=tn)
    return x_mod, (shift_ffn, scale_ffn, gate_mha, gate_ffn)


# ----------------------------------------------------------------------------
# Pure-JAX reference (mirrors the PyTorch module)
# ----------------------------------------------------------------------------
def reference_forward(params, x, c):
    mod = jax.nn.silu(c) @ params["w_mod"] + params["b_mod"]
    shift_mha, scale_mha, gate_mha, shift_ffn, scale_ffn, gate_ffn = jnp.split(
        mod, 6, axis=-1)
    mean = x.mean(-1, keepdims=True)
    var = ((x - mean) ** 2).mean(-1, keepdims=True)
    x_norm = (x - mean) / jnp.sqrt(var + EPS)
    x_norm = x_norm * params["gamma"] + params["beta"]
    x_mod = x_norm * (1.0 + scale_mha[:, None, :]) + shift_mha[:, None, :]
    return x_mod, (shift_ffn, scale_ffn, gate_mha, gate_ffn)


if __name__ == "__main__":
    key = jax.random.PRNGKey(0)
    kx, kc, kw, kb, kg, kbt = jax.random.split(key, 6)

    # C multiple of 128 (lane-dense stores); N chosen so the cdiv ragged-tail
    # path is exercised with the small tn used below.
    B, N, dim = 2, 200, 256
    params = init_params(dim)
    # The module zero-inits the modulation Linear; override with small random
    # values so the correctness check exercises the full modulation path.
    params["w_mod"] = jax.random.normal(kw, (dim, 6 * dim), jnp.float32) * 0.05
    params["b_mod"] = jax.random.normal(kb, (6 * dim,), jnp.float32) * 0.05
    params["gamma"] = 1.0 + 0.1 * jax.random.normal(kg, (dim,), jnp.float32)
    params["beta"] = 0.1 * jax.random.normal(kbt, (dim,), jnp.float32)

    x = jax.random.normal(kx, (B, N, dim), jnp.float32)
    c = jax.random.normal(kc, (B, dim), jnp.float32)

    # tn=128 forces multiple token tiles + a partial tail block at this small N.
    x_mod, gates = jax.block_until_ready(adaln_zero_forward(params, x, c, tn=128))
    ref_x_mod, ref_gates = reference_forward(params, x, c)

    np.testing.assert_allclose(np.asarray(x_mod), np.asarray(ref_x_mod),
                               rtol=5e-4, atol=1e-4)
    for got, want in zip(gates, ref_gates):
        np.testing.assert_allclose(np.asarray(got), np.asarray(want),
                                   rtol=5e-4, atol=1e-4)

    # bf16 I/O path for the hot kernel (halves HBM traffic); math stays f32.
    x_bf16 = x.astype(jnp.bfloat16)
    x_mod_bf16, _ = jax.block_until_ready(
        adaln_zero_forward(params, x_bf16, c, tn=128))
    assert x_mod_bf16.dtype == jnp.bfloat16
    np.testing.assert_allclose(np.asarray(x_mod_bf16, dtype=np.float32),
                               np.asarray(ref_x_mod), rtol=5e-2, atol=1e-1)

    print("KERNEL_OK")
</pallas_src>

<mosaic_0001>
module attributes {stable_mosaic.version = 11 : i64} {
  func.func @_adaln_cond_kernel(%arg0: i32, %arg1: memref<2x256xf32, #tpu.memory_space<vmem>>, %arg2: memref<256x1024xf32, #tpu.memory_space<vmem>>, %arg3: memref<1x1024xf32, #tpu.memory_space<vmem>>, %arg4: memref<2x1024xf32, #tpu.memory_space<vmem>>) attributes {dimension_semantics = [#tpu.dimension_semantics<parallel>], iteration_bounds = array<i64: 2>, scalar_prefetch = 0 : i64, scratch_operands = 0 : i64, tpu.core_type = #tpu.core_type<tc>, window_params = [{pipeline_mode = #tpu.pipeline_mode<synchronous>, transform_indices = @transform_0, window_bounds = array<i64: 2, 256>}, {transform_indices = @transform_1, window_bounds = array<i64: 256, 1024>}, {transform_indices = @transform_2, window_bounds = array<i64: 1, 1024>}, {transform_indices = @transform_3, window_bounds = array<i64: 2, 1024>}]} {
    %c0 = arith.constant 0 : index
    %c0_0 = arith.constant 0 : index
    %0 = vector.load %arg1[%c0, %c0_0] : memref<2x256xf32, #tpu.memory_space<vmem>>, vector<2x256xf32>
    %1 = arith.negf %0 : vector<2x256xf32>
    %2 = math.exp %1 : vector<2x256xf32>
    %cst = arith.constant 1.000000e+00 : f32
    %3 = vector.broadcast %cst : f32 to vector<2x256xf32>
    %4 = arith.addf %3, %2 : vector<2x256xf32>
    %5 = arith.divf %3, %4 : vector<2x256xf32>
    %6 = arith.mulf %0, %5 : vector<2x256xf32>
    %c0_1 = arith.constant 0 : index
    %c0_2 = arith.constant 0 : index
    %7 = vector.load %arg2[%c0_1, %c0_2] : memref<256x1024xf32, #tpu.memory_space<vmem>>, vector<256x1024xf32>
    %cst_3 = arith.constant dense<0.000000e+00> : vector<2x1024xf32>
    %8 = tpu.matmul %6, %7, %cst_3 {dimension_numbers = #tpu.dot_dimension_numbers<[1], [0], [0], [1], [0, 0, 1, 1], [], []>} : vector<2x256xf32>, vector<256x1024xf32>, vector<2x1024xf32> -> vector<2x1024xf32>
    %c0_4 = arith.constant 0 : index
    %c0_5 = arith.constant 0 : index
    %9 = vector.load %arg3[%c0_4, %c0_5] : memref<1x1024xf32, #tpu.memory_space<vmem>>, vector<1x1024xf32>
    %10 = vector.broadcast %9 : vector<1x1024xf32> to vector<2x1024xf32>
    %11 = arith.addf %8, %10 : vector<2x1024xf32>
    %c0_6 = arith.constant 0 : index
    %c0_7 = arith.constant 0 : index
    %12 = vector.load %arg4[%c0_6, %c0_7] : memref<2x1024xf32, #tpu.memory_space<vmem>>, vector<2x1024xf32>
    tpu.vector_store %arg4[%c0_6, %c0_7], %11 {strides = array<i32>} : memref<2x1024xf32, #tpu.memory_space<vmem>>, vector<2x1024xf32>,
    return
  }
  func.func @transform_0(%arg0: i32) -> (i32, i32) {
    %c0_i32 = arith.constant 0 : i32
    %c0_i32_0 = arith.constant 0 : i32
    %c0_i32_1 = arith.constant 0 : i32
    return %c0_i32, %c0_i32_0 : i32, i32
  }
  func.func @transform_1(%arg0: i32) -> (i32, i32) {
    %c0_i32 = arith.constant 0 : i32
    %c0_i32_0 = arith.constant 0 : i32
    return %c0_i32, %arg0 : i32, i32
  }
  func.func @transform_2(%arg0: i32) -> (i32, i32) {
    %c0_i32 = arith.constant 0 : i32
    %c0_i32_0 = arith.constant 0 : i32
    return %c0_i32, %arg0 : i32, i32
  }
  func.func @transform_3(%arg0: i32) -> (i32, i32) {
    %c0_i32 = arith.constant 0 : i32
    %c0_i32_0 = arith.constant 0 : i32
    return %c0_i32, %arg0 : i32, i32
  }
}

</mosaic_0001>

<bundles_post_ra>
// kernel: tpu_custom_call.1
= control target key start
LH: loop header
LB: loop body
LE: loop exit
PB: predicated region body
PF: predicated region fallthrough
CT: control target
= control target key end

     0   :  { %8 = vsyncpa [#allocation3], 0  ;;  %s2115_s0 = inlined_call_operand.hbm [shape: f32[2,256], index: 0, kind: input, shape index: {}]   ;;  %s2116_s1 = inlined_call_operand.hbm [shape: f32[256,1536], index: 1, kind: input, shape index: {}]   ;;  %s2117_s2 = inlined_call_operand.hbm [shape: f32[1,1536], index: 2, kind: input, shape index: {}]   ;;  %s2118_s3 = inlined_call_operand.hbm [shape: f32[2,1536], index: 3, kind: output, shape index: {}]  }
   0x1   :  { %9 = vsyncpa [#allocation6], 0 }
   0x2   :  { %11 = vsyncpa [#allocation6 + $0x1], 0 }
   0x3   :  { %12 = vsyncpa [#allocation4], 0 }
   0x4   :  { %14 = vsyncpa [#allocation4 + $0x1], 0  ;;  %s1568_s12 = smov 0   ;;  %s1570_s13 = smov 0  }
   0x5   :  { %s1572_s14 = smov 0   ;;  %s1574_s15 = smov 0  }
   0x6 LB: > { %s1589_s16 = sadd.s32 4294967295, %s1539_s15   ;;  %s1034_s17 = sadd.s32 4294967294, %s1539_s15   ;;  %s1539_s15 = sphi %s1574_s15, %s2141_s15   ;;  %s1535_s14 = sphi %s1572_s14, %s2140_s14   ;;  %s1531_s13 = sphi %s1570_s13, %s2139_s13   ;;  %s1527_s12 = sphi %s1568_s12, %s2138_s12  }
   0x7   : > { %s1593_s18 = sadd.s32 1, %s1539_s15   ;;  %s48_s19 = sadd.s32 1, %s1535_s14 }
   0x8   : > { %s45_s20 = ssub.s32 %s1539_s15, %s1593_s18  ;;  %p55_p0 = scmp.ne.s32.totalorder %s1535_s14, %s1531_s13 }
   0x9   : > { %p46_p1 = scmp.eq.s32.totalorder %s45_s20, 0  ;;  %p56_p2 = scmp.eq.s32.totalorder %s1539_s15, 0 }
   0xa   : > { %p61_p3 = scmp.ne.s32.totalorder %s1531_s13, %s1527_s12  ;;  %p2119_p4 = scmp.eq.s32.totalorder %s1589_s16, 0 }
   0xb   : > { %s1605_s21 = scalar_select %p46_p1, %s1535_s14, %s48_s19  }
   0xc   : > { %p1607_p5 = por %p56_p2, %p55_p0  ;;  %p1613_p6 = por %p2119_p4, %p61_p3 }
   0xd   : > { %p111_p7 = scmp.eq.s32.totalorder %s1589_s16, 1  ;;  %p117_p8 = scmp.eq.s32.totalorder %s1034_s17, 1 }
   0xe   : > { %s2123_s22 = scalar_select %p1607_p5, 1, 0 }
   0xf   : > { %s2124_s23 = scalar_select %p1613_p6, 1, 0 }
  0x10   : > { %p1035_p9 = scmp.ge.s32.totalorder %s1539_s15, 1  ;;  %p124_p10 = scmp.lt.s32.totalorder %s1539_s15, 3 }
  0x11   : > { %p1620_p11 = por %p111_p7, %p55_p0  ;;  %p1624_p12 = por %p117_p8, %p61_p3 }
  0x12   : > { %p1628_p13 = pnand %p1035_p9, %p124_p10  ;;  %s1541_s27 = smov [#allocation2]  }
  0x13   : > { %s2125_s24 = scalar_select %p1620_p11, 1, 0 }
  0x14   : > { %s2126_s25 = scalar_select %p1624_p12, 1, 0 }
  0x15   : > { %s2127_s26 = scalar_select %p1628_p13, 1, 0 }
  0x16   : > { %p1334_p1 = pneg %p1628_p13  ;;  %s137_s28 = sshll.u32 %s1541_s27, 4  ;;  %s138_s28 = int_to_ptr.vmem [resolvable:$true] %s137_s28 }
  0x17   : > { %s1385_s5 = scalar_lea.hbm %s2115_s0, 64 }
  0x18   : > { %p1636_p2 = pnand %p1334_p1, %p2119_p4  ;;  %p1386_p0 = scmp.ne.s32.totalorder %s2115_s0, %s1385_s5 }
  0x19   : > { %p1392_p9 = scmp.lt.u32.totalorder %s1385_s5, %s2115_s0 }
  0x1a   : > { %p1387_p3 = pneg %p1636_p2 }
  0x1c   : > { %p1388_p7 = pnand %p1387_p3, %p1386_p0 }
  0x1e   : > { %p1389_p8 = pneg %p1388_p7 }
  0x20   : > { %p1394_p10 = pnand %p1392_p9, %p1389_p8 }
  0x22   : > { %1397 = shalt.err (!%p1394_p10)
}
  0x23   : > { %s1398_s10 = scalar_lea.vmem %s138_s28, 64  ;;  %p1406_p11 = scmp.lt.s32.totalorder %s138_s28, %s138_s28 }
  0x24   : > { %p1399_p1 = scmp.ne.s32.totalorder %s138_s28, %s1398_s10  ;;  %p1407_p6 = scmp.lt.s32.totalorder %s1398_s10, %s1398_s10 }
  0x26   : > { %p1401_p4 = pnand %p1399_p1, %p1387_p3  ;;  %p1408_p13 = por %p1407_p6, %p1406_p11 }
  0x28   : > { %p1402_p12 = pneg %p1401_p4 }
  0x2a   : > { %p1409_p5 = pnand %p1408_p13, %p1402_p12 }
  0x2c   : > { %1412 = shalt.err (!%p1409_p5)
}
  0x2d   : > { %1337 = dma.hbm_to_vmem [thread:$0]  (!%p1636_p2), %s2115_s0, 64, %s138_s28, [#allocation3]  }
  0x2e   : > { %p2122_p0 = scmp.ge.s32.totalorder %s1539_s15, 2 }
  0x2f   : > { %p2129_p7 = scmp.ne.s32.totalorder (!%p2122_p0), %s2123_s22, 0 }
  0x30   : > { %144 = sbr.rel (%p2122_p0) target bundleno = 126 (0x7e), region = 20 }
  0x37   : > { %147 = sbr.rel (!%p2129_p7) target bundleno = 90 (0x5a), region = 24  ;;  %s148_s19 = sand.u32 (%p2129_p7), 1, %s1539_s15  }
  0x38   : > { %s150_s20 = sand.u32 (%p2129_p7), 1, %s1535_s14   ;;  %s1039_s30 = sshll.u32 (%p2129_p7), %s1539_s15, 3 }
  0x39   : > { %s1038_s27 = sshll.u32 (%p2129_p7), %s150_s20, 11  ;;  %s154_s29 = ssub.s32 (%p2129_p7), 12, %s1039_s30 }
  0x3a   : > { %p155_p4 = scmp.lt.s32.totalorder (%p2129_p7), %s154_s29, 8  ;;  %s1670_s5 = scalar_lea.sflag (%p2129_p7), [#allocation6], %s148_s19 }
  0x3b   : > { %s152_s6 = scalar_lea.vmem (%p2129_p7), [#allocation5], %s1038_s27 }
  0x3e   : > { %s2143_s29 = smov (!%p155_p4, %s154_s29), 8 }
  0x3f   : > { %s1667_s28 = sshll.u32 %s2143_s29, 12 }
  0x40   : > { %s159_s4 = ssub.s32 32768, %s1667_s28 }
  0x41   : > { %160 = vsyncadd %s1670_s5, %s159_s4  ;;  %p1041_p5 = scmp.ne.s32.totalorder %s1667_s28, 0  ;;  %s1066_s7 = sshll.u32 %s1539_s15, 10 }
  0x42   : > { %s1678_s10 = scalar_lea.hbm %s2116_s1, %s1066_s7  ;;  %s1043_s11 = sshll.u32 %s2143_s29, 3 }
  0x43   : > { %s166_s17 = sshll.u32 %s152_s6, 4  ;;  %s1413_s19 = scalar_lea.hbm %s1678_s10, %s1667_s28  ;;  %s1681_s17 = int_to_ptr.vmem [resolvable:$true] %s166_s17 }
  0x44   : > { %p1414_p6 = scmp.ne.s32.totalorder %s1678_s10, %s1413_s19  ;;  %s1417_s30 = scalar_lea.hbm %s2116_s1, 49152 }
  0x45   : > { %p1418_p13 = scmp.lt.u32.totalorder %s1678_s10, %s2116_s1  ;;  %p1419_p2 = scmp.lt.u32.totalorder %s1417_s30, %s1413_s19 }
  0x46   : > { %p1415_p11 = pnand %p1414_p6, %p1041_p5  ;;  %p1421_p8 = scmp.lt.u32.totalorder %s1413_s19, %s1678_s10 }
  0x47   : > { %p1420_p3 = por %p1419_p2, %p1418_p13 }
  0x48   : > { %p1416_p12 = pneg %p1415_p11 }
  0x49   : > { %p1422_p9 = por %p1421_p8, %p1420_p3 }
  0x4b   : > { %p1423_p10 = pnand %p1422_p9, %p1416_p12 }
  0x4d   : > { %1426 = shalt.err (!%p1423_p10)
}
  0x4e   : > { %s1427_s6 = scalar_lea.vmem %s1681_s17, %s1667_s28  ;;  %s1542_s8 = smov [#allocation5]  }
  0x4f   : > { %p1428_p1 = scmp.ne.s32.totalorder %s1681_s17, %s1427_s6  ;;  %s1431_s9 = sshll.u32 %s1542_s8, 4  ;;  %s1432_s9 = int_to_ptr.vmem [resolvable:$false] %s1431_s9 }
  0x50   : > { %s1433_s20 = scalar_lea.vmem %s1432_s9, 65536  ;;  %p1434_p6 = scmp.lt.s32.totalorder %s1681_s17, %s1432_s9 }
  0x51   : > { %p1429_p7 = pnand %p1428_p1, %p1041_p5  ;;  %p1435_p11 = scmp.lt.s32.totalorder %s1433_s20, %s1427_s6 }
  0x53   : > { %p1430_p4 = pneg %p1429_p7  ;;  %p1436_p13 = por %p1435_p11, %p1434_p6 }
  0x55   : > { %p1437_p2 = pnand %p1436_p13, %p1430_p4 }
  0x57   : > { %1440 = shalt.err (!%p1437_p2)
}
  0x58   : > { %s1543_s19 = smov 1536   ;;  %s1544_s27 = smov 1024  }
  0x59   : > { %172 = dma.hbm_to_vmem [thread:$0]  (%p1041_p5), %s1678_s10, %s1667_s28, %s1681_s17, %s1670_s5, %s1543_s19, %s1544_s27, %s1043_s11  }
  0x5a PF: > { %p2130_p12 = scmp.ne.s32.totalorder %s2123_s22, 0 }
  0x5b   : > { %s176_s30 = sand.u32 (%p2130_p12), 1, %s1539_s15   ;;  %s178_s4 = sand.u32 (%p2130_p12), 1, %s1535_s14  }
  0x5c   : > { %175 = sbr.rel (!%p2130_p12) target bundleno = 126 (0x7e), region = 28  ;;  %s1046_s7 = sshll.u32 (%p2130_p12), %s178_s4, 3 }
  0x5d   : > { %s1047_s6 = sshll.u32 (%p2130_p12), %s1539_s15, 3  ;;  %s1718_s29 = scalar_lea.sflag (%p2130_p12), [#allocation6], %s176_s30 }
  0x5e   : > { %s182_s8 = ssub.s32 (%p2130_p12), 12, %s1047_s6  ;;  %s180_s28 = scalar_lea.vmem (%p2130_p12), [#allocation7], %s1046_s7 }
  0x5f   : > { %p183_p3 = scmp.lt.s32.totalorder (%p2130_p12), %s182_s8, 8 }
  0x63   : > { %s2145_s8 = smov (!%p183_p3, %s182_s8), 8 }
  0x64   : > { %s1715_s9 = sshll.u32 %s2145_s8, 4 }
  0x65   : > { %s187_s20 = ssub.s32 128, %s1715_s9 }
  0x66   : > { %188 = vsyncadd %s1718_s29, %s187_s20  ;;  %p1049_p5 = scmp.ne.s32.totalorder %s1715_s9, 0  ;;  %s1069_s22 = sshll.u32 %s1539_s15, 7 }
  0x67   : > { %s1726_s11 = scalar_lea.hbm %s2117_s2, %s1069_s22  ;;  %s193_s17 = sshll.u32 %s180_s28, 4  ;;  %s194_s17 = int_to_ptr.vmem [resolvable:$true] %s193_s17 }
  0x68   : > { %s1441_s19 = scalar_lea.hbm %s1726_s11, %s1715_s9  ;;  %s1445_s4 = scalar_lea.hbm %s2117_s2, 192 }
  0x69   : > { %p1442_p8 = scmp.ne.s32.totalorder %s1726_s11, %s1441_s19  ;;  %p1446_p1 = scmp.lt.u32.totalorder %s1726_s11, %s2117_s2 }
  0x6a   : > { %p1447_p7 = scmp.lt.u32.totalorder %s1445_s4, %s1441_s19  ;;  %p1449_p6 = scmp.lt.u32.totalorder %s1441_s19, %s1726_s11 }
  0x6b   : > { %p1443_p9 = pnand %p1442_p8, %p1049_p5 }
  0x6c   : > { %p1448_p4 = por %p1447_p7, %p1446_p1 }
  0x6d   : > { %p1444_p10 = pneg %p1443_p9 }
  0x6e   : > { %p1450_p11 = por %p1449_p6, %p1448_p4 }
  0x70   : > { %p1451_p13 = pnand %p1450_p11, %p1444_p10 }
  0x72   : > { %1454 = shalt.err (!%p1451_p13)
}
  0x73   : > { %s1455_s8 = scalar_lea.vmem %s194_s17, %s1715_s9  ;;  %s1545_s20 = smov [#allocation7]  }
  0x74   : > { %p1456_p2 = scmp.ne.s32.totalorder %s194_s17, %s1455_s8  ;;  %s1459_s28 = sshll.u32 %s1545_s20, 4  ;;  %s1460_s28 = int_to_ptr.vmem [resolvable:$false] %s1459_s28 }
  0x75   : > { %s1461_s22 = scalar_lea.vmem %s1460_s28, 256  ;;  %p1462_p8 = scmp.lt.s32.totalorder %s194_s17, %s1460_s28 }
  0x76   : > { %p1457_p12 = pnand %p1456_p2, %p1049_p5  ;;  %p1463_p9 = scmp.lt.s32.totalorder %s1461_s22, %s1455_s8 }
  0x78   : > { %p1458_p3 = pneg %p1457_p12  ;;  %p1464_p0 = por %p1463_p9, %p1462_p8 }
  0x7a   : > { %p1465_p1 = pnand %p1464_p0, %p1458_p3 }
  0x7c   : > { %1468 = shalt.err (!%p1465_p1)
}
  0x7d   : > { %196 = dma.hbm_to_vmem [thread:$0]  (%p1049_p5), %s1726_s11, %s1715_s9, %s194_s17, %s1718_s29  }
  0x7e PF: > { %p2131_p10 = scmp.ne.s32.totalorder %s2127_s26, 0 }
  0x7f   : > { %p2132_p7 = scmp.eq.s32.totalorder (!%p2131_p10), %s1589_s16, 0 }
  0x80   : > { %202 = sbr.rel (%p2131_p10) target bundleno = 523 (0x20b), region = 32 }
  0x87   : > { %1514 = dma.done.wait (%p2132_p7), [#allocation3], 64   ;;  %p2133_p4 = pmov %p2132_p7 }
  0x88   : > { %s208_s5 = sand.u32 1, %s1589_s16   ;;  %s1757_s10 = sand.u32 1, %s1531_s13  }
  0x89   : > { %1516 = vsyncadd (%p2133_p4), [#allocation3], 4294967232  ;;  %s1053_s19 = sshll.u32 %s1757_s10, 11  ;;  %s209_s9 = scalar_lea.sflag [#allocation6], %s208_s5 }
  0x8a   : > { %s1760_s29 = scalar_lea.vmem [#allocation5], %s1053_s19  ;;  %p2134_p0 = scmp.ne.s32.totalorder %s2124_s23, 0 }
  0x8c   : > { %1518 = dma.done.wait (%p2134_p0), %s209_s9, 32896  }
  0x8d   : > { %1520 = vsyncadd (%p2134_p0), %s209_s9, 4294934400  ;;  %v273_v0 = vld [vmem:[%s1760_s29 + $0x8] sm:$0xff]  ;;  %v275_v2 = vld [vmem:[%s1760_s29 + $0x18] sm:$0xff]  ;;  %s1054_s23 = sshll.u32 %s1757_s10, 3  ;;  %s1055_s11 = sshll.u32 %s1757_s10, 4 }
  0x8e   : > { %v281_v1 = vld [vmem:[%s1760_s29 + $0x48] sm:$0xff]  ;;  %v283_v4 = vld [vmem:[%s1760_s29 + $0x58] sm:$0xff]  ;;  %v272_v5 = vld [vmem:[%s1760_s29] sm:$0xff]  ;;  %s221_s26 = scalar_lea.vmem [#allocation7], %s1054_s23  ;;  %s2048_s17 = scalar_lea.vmem [#allocation8], %s1055_s11 }
  0x8f   : > { %v1071_v3 = vpack.c.bf16 %v281_v1, %v273_v0  ;;  %v280_v6 = vld [vmem:[%s1760_s29 + $0x40] sm:$0xff]  ;;  %v1135_v7 = vpack.c.bf16 %v283_v4, %v275_v2  ;;  %v274_v9 = vld [vmem:[%s1760_s29 + $0x10] sm:$0xff]  ;;  %v289_v11 = vld [vmem:[%s1760_s29 + $0x88] sm:$0xff]  ;;  %s912_s27 = scalar_lea.sflag [#allocation4], %s1757_s10  ;;  %p2135_p5 = scmp.ne.s32.totalorder %s2125_s24, 0 }
  0x90   : > { %v1073_v8 = vpack.c.bf16 %v280_v6, %v272_v5  ;;  %v282_v10 = vld [vmem:[%s1760_s29 + $0x50] sm:$0xff]  ;;  %v297_v13 = vld [vmem:[%s1760_s29 + $0xc8] sm:$0xff]  ;;  %v291_v14 = vld [vmem:[%s1760_s29 + $0x98] sm:$0xff]  ;;  %s1058_s30 = sshll.u32 (%p2135_p5), %s1589_s16, 3 }
  0x91   : > { %1072 = vmatprep.subr.bf16.mxu0 %v1071_v3  ;;  %v1137_v12 = vpack.c.bf16 %v282_v10, %v274_v9  ;;  %v299_v15 = vld [vmem:[%s1760_s29 + $0xd8] sm:$0xff]  ;;  %1136 = vmatprep.subr.bf16.mxu1 %v1135_v7  ;;  %v1075_v16 = vpack.c.bf16 %v297_v13, %v289_v11  ;;  %v288_v18 = vld [vmem:[%s1760_s29 + $0x80] sm:$0xff]  ;;  %v290_v20 = vld [vmem:[%s1760_s29 + $0x90] sm:$0xff]  ;;  %s920_s4 = ssub.s32 (%p2135_p5), 12, %s1058_s30 }
  0x92   : > { %1074 = vmatpush1.bf16.msra.mxu0 %v1073_v8  ;;  %v1139_v17 = vpack.c.bf16 %v299_v15, %v291_v14  ;;  %v296_v19 = vld [vmem:[%s1760_s29 + $0xc0] sm:$0xff]  ;;  %v298_v22 = vld [vmem:[%s1760_s29 + $0xd0] sm:$0xff]  ;;  %v305_v23 = vld [vmem:[%s1760_s29 + $0x108] sm:$0xff]  ;;  %p921_p6 = scmp.lt.s32.totalorder (%p2135_p5), %s920_s4, 8 }
  0x93   : > { %1138 = vmatpush1.bf16.msra.mxu1 %v1137_v12  ;;  %v1077_v21 = vpack.c.bf16 %v296_v19, %v288_v18  ;;  %v313_v24 = vld [vmem:[%s1760_s29 + $0x148] sm:$0xff]  ;;  %1076 = vmatprep.subr.bf16.mxu0 %v1075_v16  ;;  %v1141_v25 = vpack.c.bf16 %v298_v22, %v290_v20  ;;  %v307_v27 = vld [vmem:[%s1760_s29 + $0x118] sm:$0xff]  ;;  %v304_v29 = vld [vmem:[%s1760_s29 + $0x100] sm:$0xff] }
  0x94   : > { %1140 = vmatprep.subr.bf16.mxu1 %v1139_v17  ;;  %v1079_v26 = vpack.c.bf16 %v313_v24, %v305_v23  ;;  %v315_v28 = vld [vmem:[%s1760_s29 + $0x158] sm:$0xff]  ;;  %v312_v31 = vld [vmem:[%s1760_s29 + $0x140] sm:$0xff]  ;;  %v306_v32 = vld [vmem:[%s1760_s29 + $0x110] sm:$0xff] }
  0x95   : > { %v1143_v30 = vpack.c.bf16 %v315_v28, %v307_v27  ;;  %v314_v33 = vld [vmem:[%s1760_s29 + $0x150] sm:$0xff]  ;;  %v1081_v34 = vpack.c.bf16 %v312_v31, %v304_v29  ;;  %v321_v35 = vld [vmem:[%s1760_s29 + $0x188] sm:$0xff]  ;;  %v323_v37 = vld [vmem:[%s1760_s29 + $0x198] sm:$0xff] }
  0x96   : > { %1078 = vmatpush1.bf16.msra.mxu0 %v1077_v21  ;;  %v329_v36 = vld [vmem:[%s1760_s29 + $0x1c8] sm:$0xff]  ;;  %v1145_v38 = vpack.c.bf16 %v314_v33, %v306_v32  ;;  %v331_v40 = vld [vmem:[%s1760_s29 + $0x1d8] sm:$0xff]  ;;  %v320_v41 = vld [vmem:[%s1760_s29 + $0x180] sm:$0xff] }
  0x97   : > { %1142 = vmatpush1.bf16.msra.mxu1 %v1141_v25  ;;  %1080 = vmatprep.subr.bf16.mxu0 %v1079_v26  ;;  %v1083_v39 = vpack.c.bf16 %v329_v36, %v321_v35  ;;  %v328_v42 = vld [vmem:[%s1760_s29 + $0x1c0] sm:$0xff]  ;;  %v1147_v43 = vpack.c.bf16 %v331_v40, %v323_v37  ;;  %v322_v44 = vld [vmem:[%s1760_s29 + $0x190] sm:$0xff]  ;;  %v337_v46 = vld [vmem:[%s1760_s29 + $0x208] sm:$0xff] }
  0x98   : > { %1144 = vmatprep.subr.bf16.mxu1 %v1143_v30  ;;  %v330_v45 = vld [vmem:[%s1760_s29 + $0x1d0] sm:$0xff]  ;;  %v345_v47 = vld [vmem:[%s1760_s29 + $0x248] sm:$0xff]  ;;  %v339_v48 = vld [vmem:[%s1760_s29 + $0x218] sm:$0xff]  ;;  %v1085_v50 = vpack.c.bf16 %v328_v42, %v320_v41 }
  0x99   : > { %v347_v49 = vld [vmem:[%s1760_s29 + $0x258] sm:$0xff]  ;;  %v1149_v51 = vpack.c.bf16 %v330_v45, %v322_v44  ;;  %v1087_v52 = vpack.c.bf16 %v345_v47, %v337_v46  ;;  %v336_v53 = vld [vmem:[%s1760_s29 + $0x200] sm:$0xff]  ;;  %v338_v55 = vld [vmem:[%s1760_s29 + $0x210] sm:$0xff] }
  0x9a   : > { %1082 = vmatpush1.bf16.msra.mxu0 %v1081_v34  ;;  %v344_v54 = vld [vmem:[%s1760_s29 + $0x240] sm:$0xff]  ;;  %v1151_v56 = vpack.c.bf16 %v347_v49, %v339_v48  ;;  %v346_v57 = vld [vmem:[%s1760_s29 + $0x250] sm:$0xff]  ;;  %v353_v58 = vld [vmem:[%s1760_s29 + $0x288] sm:$0xff] }
  0x9b   : > { %1146 = vmatpush1.bf16.msra.mxu1 %v1145_v38  ;;  %1084 = vmatprep.subr.bf16.mxu0 %v1083_v39  ;;  %v361_v59 = vld [vmem:[%s1760_s29 + $0x2c8] sm:$0xff]  ;;  %v355_v60 = vld [vmem:[%s1760_s29 + $0x298] sm:$0xff]  ;;  %v1089_v62 = vpack.c.bf16 %v344_v54, %v336_v53  ;;  %v1153_v63 = vpack.c.bf16 %v346_v57, %v338_v55  ;;  %v352_v1 = vld [vmem:[%s1760_s29 + $0x280] sm:$0xff] }
  0x9c   : > { %1148 = vmatprep.subr.bf16.mxu1 %v1147_v43  ;;  %v363_v61 = vld [vmem:[%s1760_s29 + $0x2d8] sm:$0xff]  ;;  %v1091_v0 = vpack.c.bf16 %v361_v59, %v353_v58  ;;  %v360_v2 = vld [vmem:[%s1760_s29 + $0x2c0] sm:$0xff]  ;;  %v354_v3 = vld [vmem:[%s1760_s29 + $0x290] sm:$0xff] }
  0x9d   : > { %v1155_v4 = vpack.c.bf16 %v363_v61, %v355_v60  ;;  %v362_v5 = vld [vmem:[%s1760_s29 + $0x2d0] sm:$0xff]  ;;  %v369_v6 = vld [vmem:[%s1760_s29 + $0x308] sm:$0xff]  ;;  %v371_v8 = vld [vmem:[%s1760_s29 + $0x318] sm:$0xff]  ;;  %v1093_v10 = vpack.c.bf16 %v360_v2, %v352_v1 }
  0x9e   : > { %1086 = vmatpush1.bf16.msra.mxu0 %v1085_v50  ;;  %v377_v7 = vld [vmem:[%s1760_s29 + $0x348] sm:$0xff]  ;;  %v379_v9 = vld [vmem:[%s1760_s29 + $0x358] sm:$0xff]  ;;  %v1157_v11 = vpack.c.bf16 %v362_v5, %v354_v3  ;;  %v368_v13 = vld [vmem:[%s1760_s29 + $0x300] sm:$0xff] }
  0x9f   : > { %1150 = vmatpush1.bf16.msra.mxu1 %v1149_v51  ;;  %1088 = vmatprep.subr.bf16.mxu0 %v1087_v52  ;;  %v1095_v12 = vpack.c.bf16 %v377_v7, %v369_v6  ;;  %v376_v14 = vld [vmem:[%s1760_s29 + $0x340] sm:$0xff]  ;;  %v370_v15 = vld [vmem:[%s1760_s29 + $0x310] sm:$0xff]  ;;  %v1159_v16 = vpack.c.bf16 %v379_v9, %v371_v8  ;;  %v385_v18 = vld [vmem:[%s1760_s29 + $0x388] sm:$0xff] }
  0xa0   : > { %1152 = vmatprep.subr.bf16.mxu1 %v1151_v56  ;;  %v378_v17 = vld [vmem:[%s1760_s29 + $0x350] sm:$0xff]  ;;  %v393_v19 = vld [vmem:[%s1760_s29 + $0x3c8] sm:$0xff]  ;;  %v387_v20 = vld [vmem:[%s1760_s29 + $0x398] sm:$0xff]  ;;  %v1097_v22 = vpack.c.bf16 %v376_v14, %v368_v13 }
  0xa1   : > { %v395_v21 = vld [vmem:[%s1760_s29 + $0x3d8] sm:$0xff]  ;;  %v1161_v23 = vpack.c.bf16 %v378_v17, %v370_v15  ;;  %v1099_v24 = vpack.c.bf16 %v393_v19, %v385_v18  ;;  %v384_v25 = vld [vmem:[%s1760_s29 + $0x380] sm:$0xff]  ;;  %v386_v27 = vld [vmem:[%s1760_s29 + $0x390] sm:$0xff] }
  0xa2   : > { %1090 = vmatpush1.bf16.msra.mxu0 %v1089_v62  ;;  %v392_v26 = vld [vmem:[%s1760_s29 + $0x3c0] sm:$0xff]  ;;  %v1163_v28 = vpack.c.bf16 %v395_v21, %v387_v20  ;;  %v394_v29 = vld [vmem:[%s1760_s29 + $0x3d0] sm:$0xff]  ;;  %v401_v30 = vld [vmem:[%s1760_s29 + $0x408] sm:$0xff] }
  0xa3   : > { %1154 = vmatpush1.bf16.msra.mxu1 %v1153_v63  ;;  %1092 = vmatprep.subr.bf16.mxu0 %v1091_v0  ;;  %v409_v31 = vld [vmem:[%s1760_s29 + $0x448] sm:$0xff]  ;;  %v403_v32 = vld [vmem:[%s1760_s29 + $0x418] sm:$0xff]  ;;  %v1101_v34 = vpack.c.bf16 %v392_v26, %v384_v25  ;;  %v1165_v35 = vpack.c.bf16 %v394_v29, %v386_v27  ;;  %v400_v37 = vld [vmem:[%s1760_s29 + $0x400] sm:$0xff] }
  0xa4   : > { %1156 = vmatprep.subr.bf16.mxu1 %v1155_v4  ;;  %v411_v33 = vld [vmem:[%s1760_s29 + $0x458] sm:$0xff]  ;;  %v1103_v36 = vpack.c.bf16 %v409_v31, %v401_v30  ;;  %v408_v38 = vld [vmem:[%s1760_s29 + $0x440] sm:$0xff]  ;;  %v402_v39 = vld [vmem:[%s1760_s29 + $0x410] sm:$0xff] }
  0xa5   : > { %v1167_v40 = vpack.c.bf16 %v411_v33, %v403_v32  ;;  %v410_v41 = vld [vmem:[%s1760_s29 + $0x450] sm:$0xff]  ;;  %v417_v42 = vld [vmem:[%s1760_s29 + $0x488] sm:$0xff]  ;;  %v419_v44 = vld [vmem:[%s1760_s29 + $0x498] sm:$0xff]  ;;  %v1105_v46 = vpack.c.bf16 %v408_v38, %v400_v37 }
  0xa6   : > { %1094 = vmatpush1.bf16.msra.mxu0 %v1093_v10  ;;  %v425_v43 = vld [vmem:[%s1760_s29 + $0x4c8] sm:$0xff]  ;;  %v427_v45 = vld [vmem:[%s1760_s29 + $0x4d8] sm:$0xff]  ;;  %v1169_v47 = vpack.c.bf16 %v410_v41, %v402_v39  ;;  %v416_v49 = vld [vmem:[%s1760_s29 + $0x480] sm:$0xff] }
  0xa7   : > { %1158 = vmatpush1.bf16.msra.mxu1 %v1157_v11  ;;  %1096 = vmatprep.subr.bf16.mxu0 %v1095_v12  ;;  %v1107_v48 = vpack.c.bf16 %v425_v43, %v417_v42  ;;  %v424_v50 = vld [vmem:[%s1760_s29 + $0x4c0] sm:$0xff]  ;;  %v418_v51 = vld [vmem:[%s1760_s29 + $0x490] sm:$0xff]  ;;  %v1171_v52 = vpack.c.bf16 %v427_v45, %v419_v44  ;;  %v433_v54 = vld [vmem:[%s1760_s29 + $0x508] sm:$0xff] }
  0xa8   : > { %1160 = vmatprep.subr.bf16.mxu1 %v1159_v16  ;;  %v426_v53 = vld [vmem:[%s1760_s29 + $0x4d0] sm:$0xff]  ;;  %v441_v55 = vld [vmem:[%s1760_s29 + $0x548] sm:$0xff]  ;;  %v435_v56 = vld [vmem:[%s1760_s29 + $0x518] sm:$0xff]  ;;  %v1109_v58 = vpack.c.bf16 %v424_v50, %v416_v49 }
  0xa9   : > { %v443_v57 = vld [vmem:[%s1760_s29 + $0x558] sm:$0xff]  ;;  %v1173_v59 = vpack.c.bf16 %v426_v53, %v418_v51  ;;  %v1111_v60 = vpack.c.bf16 %v441_v55, %v433_v54  ;;  %v432_v61 = vld [vmem:[%s1760_s29 + $0x500] sm:$0xff]  ;;  %v434_v63 = vld [vmem:[%s1760_s29 + $0x510] sm:$0xff] }
  0xaa   : > { %1098 = vmatpush1.bf16.msra.mxu0 %v1097_v22  ;;  %v440_v62 = vld [vmem:[%s1760_s29 + $0x540] sm:$0xff]  ;;  %v1175_v0 = vpack.c.bf16 %v443_v57, %v435_v56  ;;  %v442_v1 = vld [vmem:[%s1760_s29 + $0x550] sm:$0xff]  ;;  %v449_v2 = vld [vmem:[%s1760_s29 + $0x588] sm:$0xff] }
  0xab   : > { %1162 = vmatpush1.bf16.msra.mxu1 %v1161_v23  ;;  %1100 = vmatprep.subr.bf16.mxu0 %v1099_v24  ;;  %v457_v3 = vld [vmem:[%s1760_s29 + $0x5c8] sm:$0xff]  ;;  %v451_v4 = vld [vmem:[%s1760_s29 + $0x598] sm:$0xff]  ;;  %v1113_v6 = vpack.c.bf16 %v440_v62, %v432_v61  ;;  %v448_v7 = vld [vmem:[%s1760_s29 + $0x580] sm:$0xff]  ;;  %v1177_v8 = vpack.c.bf16 %v442_v1, %v434_v63 }
  0xac   : > { %1164 = vmatprep.subr.bf16.mxu1 %v1163_v28  ;;  %v459_v5 = vld [vmem:[%s1760_s29 + $0x5d8] sm:$0xff]  ;;  %v1115_v9 = vpack.c.bf16 %v457_v3, %v449_v2  ;;  %v456_v10 = vld [vmem:[%s1760_s29 + $0x5c0] sm:$0xff]  ;;  %v450_v11 = vld [vmem:[%s1760_s29 + $0x590] sm:$0xff] }
  0xad   : > { %v458_v12 = vld [vmem:[%s1760_s29 + $0x5d0] sm:$0xff]  ;;  %v1179_v13 = vpack.c.bf16 %v459_v5, %v451_v4  ;;  %v465_v14 = vld [vmem:[%s1760_s29 + $0x608] sm:$0xff]  ;;  %v1864_v16 = vld [vmem:[#allocation2] sm:$0xf]  ;;  %v1117_v20 = vpack.c.bf16 %v456_v10, %v448_v7  ;;  %v530_v4 = vlaneseq  ;;  %v1546_v5 = vmov 1983009808  }
  0xae   : > { %1102 = vmatpush1.bf16.msra.mxu0 %v1101_v34  ;;  %v473_v15 = vld [vmem:[%s1760_s29 + $0x648] sm:$0xff]  ;;  %v467_v17 = vld [vmem:[%s1760_s29 + $0x618] sm:$0xff]  ;;  %v1056_v19 = vmul.f32 -1.442695, %v1864_v16  ;;  %v1181_v21 = vpack.c.bf16 %v458_v12, %v450_v11  ;;  %v464_v23 = vld [vmem:[%s1760_s29 + $0x600] sm:$0xff] }
  0xaf   : > { %1166 = vmatpush1.bf16.msra.mxu1 %v1165_v35  ;;  %1104 = vmatprep.subr.bf16.mxu0 %v1103_v36  ;;  %v475_v18 = vld [vmem:[%s1760_s29 + $0x658] sm:$0xff]  ;;  %v1119_v22 = vpack.c.bf16 %v473_v15, %v465_v14  ;;  %v472_v24 = vld [vmem:[%s1760_s29 + $0x640] sm:$0xff]  ;;  %v466_v25 = vld [vmem:[%s1760_s29 + $0x610] sm:$0xff] }
  0xb0   : > { %1168 = vmatprep.subr.bf16.mxu1 %v1167_v40  ;;  %1381 = vpow2.f32 %v1056_v19  ;;  %v1183_v26 = vpack.c.bf16 %v475_v18, %v467_v17  ;;  %v474_v27 = vld [vmem:[%s1760_s29 + $0x650] sm:$0xff]  ;;  %v481_v28 = vld [vmem:[%s1760_s29 + $0x688] sm:$0xff]  ;;  %v483_v30 = vld [vmem:[%s1760_s29 + $0x698] sm:$0xff]  ;;  %v1121_v32 = vpack.c.bf16 %v472_v24, %v464_v23 }
  0xb1   : > { %v489_v29 = vld [vmem:[%s1760_s29 + $0x6c8] sm:$0xff]  ;;  %v491_v31 = vld [vmem:[%s1760_s29 + $0x6d8] sm:$0xff]  ;;  %v1185_v33 = vpack.c.bf16 %v474_v27, %v466_v25  ;;  %v480_v35 = vld [vmem:[%s1760_s29 + $0x680] sm:$0xff] }
  0xb2   : > { %1106 = vmatpush1.bf16.msra.mxu0 %v1105_v46  ;;  %v1123_v34 = vpack.c.bf16 %v489_v29, %v481_v28  ;;  %v488_v36 = vld [vmem:[%s1760_s29 + $0x6c0] sm:$0xff]  ;;  %v482_v37 = vld [vmem:[%s1760_s29 + $0x690] sm:$0xff]  ;;  %v1187_v38 = vpack.c.bf16 %v491_v31, %v483_v30  ;;  %v497_v40 = vld [vmem:[%s1760_s29 + $0x708] sm:$0xff] }
  0xb3   : > { %1170 = vmatpush1.bf16.msra.mxu1 %v1169_v47  ;;  %1108 = vmatprep.subr.bf16.mxu0 %v1107_v48  ;;  %v490_v39 = vld [vmem:[%s1760_s29 + $0x6d0] sm:$0xff]  ;;  %v505_v41 = vld [vmem:[%s1760_s29 + $0x748] sm:$0xff]  ;;  %v499_v42 = vld [vmem:[%s1760_s29 + $0x718] sm:$0xff]  ;;  %v1125_v44 = vpack.c.bf16 %v488_v36, %v480_v35 }
  0xb4   : > { %1172 = vmatprep.subr.bf16.mxu1 %v1171_v52  ;;  %v507_v43 = vld [vmem:[%s1760_s29 + $0x758] sm:$0xff]  ;;  %v1189_v45 = vpack.c.bf16 %v490_v39, %v482_v37  ;;  %v1127_v46 = vpack.c.bf16 %v505_v41, %v497_v40  ;;  %v496_v47 = vld [vmem:[%s1760_s29 + $0x700] sm:$0xff]  ;;  %v498_v49 = vld [vmem:[%s1760_s29 + $0x710] sm:$0xff] }
  0xb5   : > { %v504_v48 = vld [vmem:[%s1760_s29 + $0x740] sm:$0xff]  ;;  %v1191_v50 = vpack.c.bf16 %v507_v43, %v499_v42  ;;  %v506_v51 = vld [vmem:[%s1760_s29 + $0x750] sm:$0xff]  ;;  %v513_v52 = vld [vmem:[%s1760_s29 + $0x788] sm:$0xff] }
  0xb6   : > { %1110 = vmatpush1.bf16.msra.mxu0 %v1109_v58  ;;  %v521_v53 = vld [vmem:[%s1760_s29 + $0x7c8] sm:$0xff]  ;;  %v515_v55 = vld [vmem:[%s1760_s29 + $0x798] sm:$0xff]  ;;  %v1129_v57 = vpack.c.bf16 %v504_v48, %v496_v47  ;;  %v512_v61 = vld [vmem:[%s1760_s29 + $0x780] sm:$0xff] }
  0xb7   : > { %1174 = vmatpush1.bf16.msra.mxu1 %v1173_v59  ;;  %1112 = vmatprep.subr.bf16.mxu0 %v1111_v60  ;;  %v523_v56 = vld [vmem:[%s1760_s29 + $0x7d8] sm:$0xff]  ;;  %v1193_v59 = vpack.c.bf16 %v506_v51, %v498_v49  ;;  %v1131_v60 = vpack.c.bf16 %v521_v53, %v513_v52  ;;  %v520_v62 = vld [vmem:[%s1760_s29 + $0x7c0] sm:$0xff]  ;;  %v514_v63 = vld [vmem:[%s1760_s29 + $0x790] sm:$0xff] }
  0xb8   : > { %1176 = vmatprep.subr.bf16.mxu1 %v1175_v0  ;;  %v1195_v0 = vpack.c.bf16 %v523_v56, %v515_v55  ;;  %v522_v1 = vld [vmem:[%s1760_s29 + $0x7d0] sm:$0xff]  ;;  %v277_v2 = vld [vmem:[%s1760_s29 + $0x28] sm:$0xff]  ;;  %v279_v7 = vld [vmem:[%s1760_s29 + $0x38] sm:$0xff] }
  0xb9   : > { %v285_v3 = vld [vmem:[%s1760_s29 + $0x68] sm:$0xff]  ;;  %v1197_v10 = vpack.c.bf16 %v522_v1, %v514_v63  ;;  %v276_v19 = vld [vmem:[%s1760_s29 + $0x20] sm:$0xff]  ;;  %v303_v27 = vld [vmem:[%s1760_s29 + $0xf8] sm:$0xff] }
  0xba   : > { %1114 = vmatpush1.bf16.msra.mxu0 %v1113_v6  ;;  %v1382_v54 = vpop.eup %1381  ;;  %v572_v6 = vunpack.c.l.s4 %v1546_v5  ;;  %v1199_v11 = vpack.c.bf16 %v285_v3, %v277_v2  ;;  %v293_v23 = vld [vmem:[%s1760_s29 + $0xa8] sm:$0xff]  ;;  %v292_v30 = vld [vmem:[%s1760_s29 + $0xa0] sm:$0xff]  ;;  %v302_v35 = vld [vmem:[%s1760_s29 + $0xf0] sm:$0xff] }
  0xbb   : > { %1178 = vmatpush1.bf16.msra.mxu1 %v1177_v8  ;;  %1116 = vmatprep.subr.bf16.mxu0 %v1115_v9  ;;  %v268_v58 = vadd.f32 1.0, %v1382_v54  ;;  %v287_v8 = vld [vmem:[%s1760_s29 + $0x78] sm:$0xff]  ;;  %v1133_v9 = vpack.c.bf16 %v520_v62, %v512_v61  ;;  %v301_v25 = vld [vmem:[%s1760_s29 + $0xe8] sm:$0xff]  ;;  %v300_v31 = vld [vmem:[%s1760_s29 + $0xe0] sm:$0xff] }
  0xbc   : > { %1180 = vmatprep.subr.bf16.mxu1 %v1179_v13  ;;  %v1263_v12 = vpack.c.bf16 %v287_v8, %v279_v7  ;;  %v1901_v13 = vshrl.u32 %v530_v4, 7  ;;  %v573_v14 = vunpack.c.0.s8 %v572_v6  ;;  %v309_v36 = vld [vmem:[%s1760_s29 + $0x128] sm:$0xff]  ;;  %v319_v39 = vld [vmem:[%s1760_s29 + $0x178] sm:$0xff]  ;;  %v1205_v40 = vpack.c.bf16 %v300_v31, %v292_v30  ;;  %v308_v42 = vld [vmem:[%s1760_s29 + $0x120] sm:$0xff] }
  0xbd   : > { %1383 = vrcp.f32 %v268_v58  ;;  %v317_v37 = vld [vmem:[%s1760_s29 + $0x168] sm:$0xff]  ;;  %v316_v43 = vld [vmem:[%s1760_s29 + $0x160] sm:$0xff]  ;;  %v318_v47 = vld [vmem:[%s1760_s29 + $0x170] sm:$0xff] }
  0xbe   : > { %1118 = vmatpush1.bf16.msra.mxu0 %v1117_v20  ;;  %v1904_v15 = vsub.s32 %v573_v14, %v1901_v13  ;;  %v284_v20 = vld [vmem:[%s1760_s29 + $0x60] sm:$0xff]  ;;  %v325_v48 = vld [vmem:[%s1760_s29 + $0x1a8] sm:$0xff]  ;;  %v335_v51 = vld [vmem:[%s1760_s29 + $0x1f8] sm:$0xff]  ;;  %v1209_v52 = vpack.c.bf16 %v316_v43, %v308_v42 }
  0xbf   : > { %1182 = vmatpush1.bf16.msra.mxu1 %v1181_v21  ;;  %1120 = vmatprep.subr.bf16.mxu0 %v1119_v22  ;;  %v278_v21 = vld [vmem:[%s1760_s29 + $0x30] sm:$0xff]  ;;  %v1201_v28 = vpack.c.bf16 %v284_v20, %v276_v19  ;;  %v333_v49 = vld [vmem:[%s1760_s29 + $0x1e8] sm:$0xff]  ;;  %v324_v54 = vld [vmem:[%s1760_s29 + $0x1a0] sm:$0xff] }
  0xc0   : > { %1184 = vmatprep.subr.bf16.mxu1 %v1183_v26  ;;  %v286_v22 = vld [vmem:[%s1760_s29 + $0x70] sm:$0xff]  ;;  %v295_v26 = vld [vmem:[%s1760_s29 + $0xb8] sm:$0xff]  ;;  %v332_v55 = vld [vmem:[%s1760_s29 + $0x1e0] sm:$0xff]  ;;  %v1211_v56 = vpack.c.bf16 %v333_v49, %v325_v48 }
  0xc1   : > { %v1265_v29 = vpack.c.bf16 %v286_v22, %v278_v21  ;;  %v326_v58 = vld [vmem:[%s1760_s29 + $0x1b0] sm:$0xff]  ;;  %v349_v61 = vld [vmem:[%s1760_s29 + $0x268] sm:$0xff]  ;;  %v343_v62 = vld [vmem:[%s1760_s29 + $0x238] sm:$0xff] }
  0xc2   : > { %1122 = vmatpush1.bf16.msra.mxu0 %v1121_v32  ;;  %v1203_v32 = vpack.c.bf16 %v301_v25, %v293_v23  ;;  %v351_v63 = vld [vmem:[%s1760_s29 + $0x278] sm:$0xff]  ;;  %v340_v2 = vld [vmem:[%s1760_s29 + $0x220] sm:$0xff]  ;;  %v342_v6 = vld [vmem:[%s1760_s29 + $0x230] sm:$0xff] }
  0xc3   : > { %1186 = vmatpush1.bf16.msra.mxu1 %v1185_v33  ;;  %1124 = vmatprep.subr.bf16.mxu0 %v1123_v34  ;;  %v1267_v33 = vpack.c.bf16 %v303_v27, %v295_v26  ;;  %v294_v34 = vld [vmem:[%s1760_s29 + $0xb0] sm:$0xff]  ;;  %v348_v3 = vld [vmem:[%s1760_s29 + $0x260] sm:$0xff]  ;;  %v1279_v5 = vpack.c.bf16 %v351_v63, %v343_v62  ;;  %v357_v8 = vld [vmem:[%s1760_s29 + $0x2a8] sm:$0xff] }
  0xc4   : > { %1188 = vmatprep.subr.bf16.mxu1 %v1187_v38  ;;  %v311_v38 = vld [vmem:[%s1760_s29 + $0x138] sm:$0xff]  ;;  %v1269_v41 = vpack.c.bf16 %v302_v35, %v294_v34  ;;  %v350_v7 = vld [vmem:[%s1760_s29 + $0x270] sm:$0xff]  ;;  %v373_v23 = vld [vmem:[%s1760_s29 + $0x328] sm:$0xff] }
  0xc5   : > { %v1281_v14 = vpack.c.bf16 %v350_v7, %v342_v6  ;;  %v358_v21 = vld [vmem:[%s1760_s29 + $0x2b0] sm:$0xff]  ;;  %v381_v25 = vld [vmem:[%s1760_s29 + $0x368] sm:$0xff]  ;;  %v375_v26 = vld [vmem:[%s1760_s29 + $0x338] sm:$0xff] }
  0xc6   : > { %1126 = vmatpush1.bf16.msra.mxu0 %v1125_v44  ;;  %v1207_v44 = vpack.c.bf16 %v317_v37, %v309_v36  ;;  %v366_v22 = vld [vmem:[%s1760_s29 + $0x2f0] sm:$0xff]  ;;  %v383_v27 = vld [vmem:[%s1760_s29 + $0x378] sm:$0xff]  ;;  %v380_v30 = vld [vmem:[%s1760_s29 + $0x360] sm:$0xff]  ;;  %v1223_v31 = vpack.c.bf16 %v381_v25, %v373_v23 }
  0xc7   : > { %1190 = vmatpush1.bf16.msra.mxu1 %v1189_v45  ;;  %1128 = vmatprep.subr.bf16.mxu0 %v1127_v46  ;;  %v1384_v17 = vpop.eup %1383  ;;  %v1271_v45 = vpack.c.bf16 %v319_v39, %v311_v38  ;;  %v310_v46 = vld [vmem:[%s1760_s29 + $0x130] sm:$0xff]  ;;  %v389_v35 = vld [vmem:[%s1760_s29 + $0x3a8] sm:$0xff]  ;;  %v391_v37 = vld [vmem:[%s1760_s29 + $0x3b8] sm:$0xff] }
  0xc8   : > { %1192 = vmatprep.subr.bf16.mxu1 %v1191_v50  ;;  %v271_v18 = vmul.f32 %v1384_v17, %v1864_v16  ;;  %v327_v50 = vld [vmem:[%s1760_s29 + $0x1b8] sm:$0xff]  ;;  %v1273_v53 = vpack.c.bf16 %v318_v47, %v310_v46  ;;  %v356_v17 = vld [vmem:[%s1760_s29 + $0x2a0] sm:$0xff]  ;;  %v382_v34 = vld [vmem:[%s1760_s29 + $0x370] sm:$0xff] }
  0xc9   : > { %v397_v36 = vld [vmem:[%s1760_s29 + $0x3e8] sm:$0xff]  ;;  %v399_v38 = vld [vmem:[%s1760_s29 + $0x3f8] sm:$0xff]  ;;  %v396_v42 = vld [vmem:[%s1760_s29 + $0x3e0] sm:$0xff] }
  0xca   : > { %1130 = vmatpush1.bf16.msra.mxu0 %v1129_v57  ;;  %v1913_v24 = vrot.slane %v271_v18, %v1904_v15  ;;  %v1275_v57 = vpack.c.bf16 %v335_v51, %v327_v50  ;;  %v364_v18 = vld [vmem:[%s1760_s29 + $0x2e0] sm:$0xff]  ;;  %v1227_v43 = vpack.c.bf16 %v397_v36, %v389_v35  ;;  %v398_v46 = vld [vmem:[%s1760_s29 + $0x3f0] sm:$0xff]  ;;  %v405_v47 = vld [vmem:[%s1760_s29 + $0x428] sm:$0xff] }
  0xcb   : > { %1194 = vmatpush1.bf16.msra.mxu1 %v1193_v59  ;;  %1132 = vmatprep.subr.bf16.mxu0 %v1131_v60  ;;  %v334_v59 = vld [vmem:[%s1760_s29 + $0x1f0] sm:$0xff]  ;;  %v341_v60 = vld [vmem:[%s1760_s29 + $0x228] sm:$0xff]  ;;  %v407_v49 = vld [vmem:[%s1760_s29 + $0x438] sm:$0xff] }
  0xcc   : > { %1196 = vmatprep.subr.bf16.mxu1 %v1195_v0  ;;  %v578_v16 = vcombine.high %v1913_v24, %v1913_v24  ;;  %v1213_v0 = vpack.c.bf16 %v332_v55, %v324_v54  ;;  %v1277_v1 = vpack.c.bf16 %v334_v59, %v326_v58  ;;  %v1215_v4 = vpack.c.bf16 %v349_v61, %v341_v60  ;;  %v413_v48 = vld [vmem:[%s1760_s29 + $0x468] sm:$0xff]  ;;  %v415_v50 = vld [vmem:[%s1760_s29 + $0x478] sm:$0xff]  ;;  %v412_v54 = vld [vmem:[%s1760_s29 + $0x460] sm:$0xff] }
  0xcd   : > { %v1231_v55 = vpack.c.bf16 %v413_v48, %v405_v47  ;;  %v414_v58 = vld [vmem:[%s1760_s29 + $0x470] sm:$0xff]  ;;  %v421_v59 = vld [vmem:[%s1760_s29 + $0x4a8] sm:$0xff]  ;;  %v423_v61 = vld [vmem:[%s1760_s29 + $0x4b8] sm:$0xff] }
  0xce   : > { %1134 = vmatpush1.bf16.msra.mxu0 %v1133_v9  ;;  %645 = vmatprep.mubr.f32.mxu0 %v578_v16  ;;  %v365_v9 = vld [vmem:[%s1760_s29 + $0x2e8] sm:$0xff]  ;;  %v431_v62 = vld [vmem:[%s1760_s29 + $0x4f8] sm:$0xff]  ;;  %v430_v6 = vld [vmem:[%s1760_s29 + $0x4f0] sm:$0xff] }
  0xcf   : > { %1198 = vmatpush1.bf16.msra.mxu1 %v1197_v10  ;;  %1200 = vmatprep.subr.bf16.mxu0 %v1199_v11  ;;  %v359_v10 = vld [vmem:[%s1760_s29 + $0x2b8] sm:$0xff]  ;;  %v1219_v19 = vpack.c.bf16 %v365_v9, %v357_v8  ;;  %v429_v60 = vld [vmem:[%s1760_s29 + $0x4e8] sm:$0xff] }
  0xd0   : > { %1264 = vmatprep.subr.bf16.mxu1 %v1263_v12  ;;  %716 = vmatprep.mubr.f32.mxu1 %v578_v16  ;;  %v367_v11 = vld [vmem:[%s1760_s29 + $0x2f8] sm:$0xff]  ;;  %v1217_v12 = vpack.c.bf16 %v348_v3, %v340_v2  ;;  %v428_v2 = vld [vmem:[%s1760_s29 + $0x4e0] sm:$0xff]  ;;  %v1235_v3 = vpack.c.bf16 %v429_v60, %v421_v59  ;;  %v437_v7 = vld [vmem:[%s1760_s29 + $0x528] sm:$0xff] }
  0xd1   : > { %646 = vmatmul.mubr.f32.vlgmr.msra.gmra.mrb[0].mxu0 %v1913_v24  ;;  %v1283_v20 = vpack.c.bf16 %v367_v11, %v359_v10  ;;  %v445_v8 = vld [vmem:[%s1760_s29 + $0x568] sm:$0xff]  ;;  %v439_v9 = vld [vmem:[%s1760_s29 + $0x538] sm:$0xff] }
  0xd2   : > { %717 = vmatmul.mubr.f32.vlgmr.msra.gmra.mrb[0].mxu1 %v1913_v24  ;;  %1202 = vmatpush1.bf16.msra.mxu0 %v1201_v28  ;;  %v1285_v28 = vpack.c.bf16 %v366_v22, %v358_v21  ;;  %v447_v10 = vld [vmem:[%s1760_s29 + $0x578] sm:$0xff]  ;;  %v446_v21 = vld [vmem:[%s1760_s29 + $0x570] sm:$0xff]  ;;  %v453_v22 = vld [vmem:[%s1760_s29 + $0x5a8] sm:$0xff] }
  0xd3   : > { %1266 = vmatpush1.bf16.msra.mxu1 %v1265_v29  ;;  %1204 = vmatprep.subr.bf16.mxu0 %v1203_v32  ;;  %v372_v29 = vld [vmem:[%s1760_s29 + $0x320] sm:$0xff]  ;;  %v1287_v32 = vpack.c.bf16 %v383_v27, %v375_v26  ;;  %v461_v23 = vld [vmem:[%s1760_s29 + $0x5e8] sm:$0xff]  ;;  %v455_v25 = vld [vmem:[%s1760_s29 + $0x5b8] sm:$0xff] }
  0xd4   : > { %1268 = vmatprep.subr.bf16.mxu1 %v1267_v33  ;;  %787 = vmatprep.mubr.f32.mxu0 %v578_v16  ;;  %v374_v33 = vld [vmem:[%s1760_s29 + $0x330] sm:$0xff]  ;;  %v1225_v39 = vpack.c.bf16 %v380_v30, %v372_v29  ;;  %v463_v26 = vld [vmem:[%s1760_s29 + $0x5f8] sm:$0xff]  ;;  %v460_v29 = vld [vmem:[%s1760_s29 + $0x5e0] sm:$0xff]  ;;  %v1243_v30 = vpack.c.bf16 %v461_v23, %v453_v22  ;;  %v532_v23 = vsub.s32 0, %v1901_v13 }
  0xd5   : > { %858 = vmatprep.mubr.f32.mxu1 %v578_v16  ;;  %v1221_v16 = vpack.c.bf16 %v364_v18, %v356_v17  ;;  %v444_v17 = vld [vmem:[%s1760_s29 + $0x560] sm:$0xff]  ;;  %v1239_v18 = vpack.c.bf16 %v445_v8, %v437_v7  ;;  %v477_v35 = vld [vmem:[%s1760_s29 + $0x668] sm:$0xff]  ;;  %v471_v36 = vld [vmem:[%s1760_s29 + $0x638] sm:$0xff] }
  0xd6   : > { %1206 = vmatpush1.bf16.msra.mxu0 %v1205_v40  ;;  %v1289_v40 = vpack.c.bf16 %v382_v34, %v374_v33  ;;  %v462_v33 = vld [vmem:[%s1760_s29 + $0x5f0] sm:$0xff]  ;;  %v469_v34 = vld [vmem:[%s1760_s29 + $0x628] sm:$0xff]  ;;  %v487_v48 = vld [vmem:[%s1760_s29 + $0x6b8] sm:$0xff] }
  0xd7   : > { %1270 = vmatpush1.bf16.msra.mxu1 %v1269_v41  ;;  %1208 = vmatprep.subr.bf16.mxu0 %v1207_v44  ;;  %v388_v41 = vld [vmem:[%s1760_s29 + $0x3a0] sm:$0xff]  ;;  %v1291_v44 = vpack.c.bf16 %v399_v38, %v391_v37  ;;  %v479_v37 = vld [vmem:[%s1760_s29 + $0x678] sm:$0xff]  ;;  %v493_v47 = vld [vmem:[%s1760_s29 + $0x6e8] sm:$0xff] }
  0xd8   : > { %1272 = vmatprep.subr.bf16.mxu1 %v1271_v45  ;;  %v390_v45 = vld [vmem:[%s1760_s29 + $0x3b0] sm:$0xff]  ;;  %v1229_v51 = vpack.c.bf16 %v396_v42, %v388_v41  ;;  %v476_v41 = vld [vmem:[%s1760_s29 + $0x660] sm:$0xff]  ;;  %v1247_v42 = vpack.c.bf16 %v477_v35, %v469_v34  ;;  %v509_v59 = vld [vmem:[%s1760_s29 + $0x768] sm:$0xff] }
  0xd9   : > { %v503_v60 = vld [vmem:[%s1760_s29 + $0x738] sm:$0xff]  ;;  %v525_v7 = vld [vmem:[%s1760_s29 + $0x7e8] sm:$0xff] }
  0xda   : > { %1210 = vmatpush1.bf16.msra.mxu0 %v1209_v52  ;;  %v1293_v52 = vpack.c.bf16 %v398_v46, %v390_v45  ;;  %v478_v45 = vld [vmem:[%s1760_s29 + $0x670] sm:$0xff]  ;;  %v485_v46 = vld [vmem:[%s1760_s29 + $0x6a8] sm:$0xff]  ;;  %v519_v8 = vld [vmem:[%s1760_s29 + $0x7b8] sm:$0xff] }
  0xdb   : > { %1274 = vmatpush1.bf16.msra.mxu1 %v1273_v53  ;;  %1212 = vmatprep.subr.bf16.mxu0 %v1211_v56  ;;  %v404_v53 = vld [vmem:[%s1760_s29 + $0x420] sm:$0xff]  ;;  %v1295_v56 = vpack.c.bf16 %v415_v50, %v407_v49  ;;  %v495_v49 = vld [vmem:[%s1760_s29 + $0x6f8] sm:$0xff] }
  0xdc   : > { %1276 = vmatprep.subr.bf16.mxu1 %v1275_v57  ;;  %v406_v57 = vld [vmem:[%s1760_s29 + $0x430] sm:$0xff]  ;;  %v1233_v63 = vpack.c.bf16 %v412_v54, %v404_v53  ;;  %v492_v53 = vld [vmem:[%s1760_s29 + $0x6e0] sm:$0xff]  ;;  %v1251_v54 = vpack.c.bf16 %v493_v47, %v485_v46  ;;  %v552_v46 = vsub.s32 5, %v1901_v13  ;;  %v560_v47 = vsub.s32 7, %v1901_v13 }
  0xde   : > { %1214 = vmatpush1.bf16.msra.mxu0 %v1213_v0  ;;  %v1297_v0 = vpack.c.bf16 %v414_v58, %v406_v57  ;;  %v494_v57 = vld [vmem:[%s1760_s29 + $0x6f0] sm:$0xff]  ;;  %v501_v58 = vld [vmem:[%s1760_s29 + $0x728] sm:$0xff] }
  0xdf   : > { %1278 = vmatpush1.bf16.msra.mxu1 %v1277_v1  ;;  %1216 = vmatprep.subr.bf16.mxu0 %v1215_v4  ;;  %v420_v1 = vld [vmem:[%s1760_s29 + $0x4a0] sm:$0xff]  ;;  %v1299_v4 = vpack.c.bf16 %v431_v62, %v423_v61  ;;  %v511_v61 = vld [vmem:[%s1760_s29 + $0x778] sm:$0xff] }
  0xe0   : > { %1280 = vmatprep.subr.bf16.mxu1 %v1279_v5  ;;  %v422_v5 = vld [vmem:[%s1760_s29 + $0x4b0] sm:$0xff]  ;;  %v1237_v11 = vpack.c.bf16 %v428_v2, %v420_v1  ;;  %v508_v1 = vld [vmem:[%s1760_s29 + $0x760] sm:$0xff]  ;;  %v1255_v2 = vpack.c.bf16 %v509_v59, %v501_v58 }
  0xe2   : > { %1218 = vmatpush1.bf16.msra.mxu0 %v1217_v12  ;;  %v1301_v12 = vpack.c.bf16 %v430_v6, %v422_v5  ;;  %v510_v5 = vld [vmem:[%s1760_s29 + $0x770] sm:$0xff]  ;;  %v517_v6 = vld [vmem:[%s1760_s29 + $0x7a8] sm:$0xff] }
  0xe3   : > { %1282 = vmatpush1.bf16.msra.mxu1 %v1281_v14  ;;  %1220 = vmatprep.subr.bf16.mxu0 %v1219_v19  ;;  %v436_v14 = vld [vmem:[%s1760_s29 + $0x520] sm:$0xff]  ;;  %v1303_v19 = vpack.c.bf16 %v447_v10, %v439_v9  ;;  %v527_v9 = vld [vmem:[%s1760_s29 + $0x7f8] sm:$0xff] }
  0xe4   : > { %1284 = vmatprep.subr.bf16.mxu1 %v1283_v20  ;;  %v438_v20 = vld [vmem:[%s1760_s29 + $0x530] sm:$0xff]  ;;  %v1241_v27 = vpack.c.bf16 %v444_v17, %v436_v14  ;;  %v1259_v14 = vpack.c.bf16 %v525_v7, %v517_v6  ;;  %v1323_v17 = vpack.c.bf16 %v527_v9, %v519_v8 }
  0xe6   : > { %1222 = vmatpush1.bf16.msra.mxu0 %v1221_v16  ;;  %v1305_v16 = vpack.c.bf16 %v446_v21, %v438_v20  ;;  %v526_v20 = vld [vmem:[%s1760_s29 + $0x7f0] sm:$0xff] }
  0xe7   : > { %1286 = vmatpush1.bf16.msra.mxu1 %v1285_v28  ;;  %1224 = vmatprep.subr.bf16.mxu0 %v1223_v31  ;;  %v452_v28 = vld [vmem:[%s1760_s29 + $0x5a0] sm:$0xff]  ;;  %v1307_v31 = vpack.c.bf16 %v463_v26, %v455_v25  ;;  %v540_v25 = vsub.s32 2, %v1901_v13 }
  0xe8   : > { %1288 = vmatprep.subr.bf16.mxu1 %v1287_v32  ;;  %v454_v32 = vld [vmem:[%s1760_s29 + $0x5b0] sm:$0xff]  ;;  %v1245_v38 = vpack.c.bf16 %v460_v29, %v452_v28  ;;  %v528_v26 = vld [vmem:[%s221_s26] sm:$0xff] }
  0xe9   : > { %v533_v28 = vrot.slane %v528_v26, %v532_v23  ;;  %v541_v29 = vrot.slane %v528_v26, %v540_v25 }
  0xea   : > { %1226 = vmatpush1.bf16.msra.mxu0 %v1225_v39  ;;  %v1309_v39 = vpack.c.bf16 %v462_v33, %v454_v32 }
  0xeb   : > { %1290 = vmatpush1.bf16.msra.mxu1 %v1289_v40  ;;  %1228 = vmatprep.subr.bf16.mxu0 %v1227_v43  ;;  %v468_v40 = vld [vmem:[%s1760_s29 + $0x620] sm:$0xff]  ;;  %v1311_v43 = vpack.c.bf16 %v479_v37, %v471_v36 }
  0xec   : > { %1292 = vmatprep.subr.bf16.mxu1 %v1291_v44  ;;  %v470_v44 = vld [vmem:[%s1760_s29 + $0x630] sm:$0xff]  ;;  %v1249_v50 = vpack.c.bf16 %v476_v41, %v468_v40 }
  0xee   : > { %1230 = vmatpush1.bf16.msra.mxu0 %v1229_v51  ;;  %v1313_v51 = vpack.c.bf16 %v478_v45, %v470_v44  ;;  %v548_v44 = vsub.s32 4, %v1901_v13  ;;  %v556_v45 = vsub.s32 6, %v1901_v13 }
  0xef   : > { %1294 = vmatpush1.bf16.msra.mxu1 %v1293_v52  ;;  %1232 = vmatprep.subr.bf16.mxu0 %v1231_v55  ;;  %v484_v52 = vld [vmem:[%s1760_s29 + $0x6a0] sm:$0xff]  ;;  %v1315_v55 = vpack.c.bf16 %v495_v49, %v487_v48 }
  0xf0   : > { %1296 = vmatprep.subr.bf16.mxu1 %v1295_v56  ;;  %v486_v56 = vld [vmem:[%s1760_s29 + $0x6b0] sm:$0xff]  ;;  %v1253_v62 = vpack.c.bf16 %v492_v53, %v484_v52  ;;  %v549_v48 = vrot.slane %v528_v26, %v548_v44  ;;  %v557_v49 = vrot.slane %v528_v26, %v556_v45 }
  0xf2   : > { %1234 = vmatpush1.bf16.msra.mxu0 %v1233_v63  ;;  %v1317_v63 = vpack.c.bf16 %v494_v57, %v486_v56 }
  0xf3   : > { %1298 = vmatpush1.bf16.msra.mxu1 %v1297_v0  ;;  %1236 = vmatprep.subr.bf16.mxu0 %v1235_v3  ;;  %v500_v0 = vld [vmem:[%s1760_s29 + $0x720] sm:$0xff]  ;;  %v1319_v3 = vpack.c.bf16 %v511_v61, %v503_v60 }
  0xf4   : > { %1300 = vmatprep.subr.bf16.mxu1 %v1299_v4  ;;  %v502_v4 = vld [vmem:[%s1760_s29 + $0x730] sm:$0xff]  ;;  %v1257_v10 = vpack.c.bf16 %v508_v1, %v500_v0 }
  0xf6   : > { %1238 = vmatpush1.bf16.msra.mxu0 %v1237_v11  ;;  %v1321_v11 = vpack.c.bf16 %v510_v5, %v502_v4 }
  0xf7   : > { %1302 = vmatpush1.bf16.msra.mxu1 %v1301_v12  ;;  %1240 = vmatprep.subr.bf16.mxu0 %v1239_v18  ;;  %v516_v12 = vld [vmem:[%s1760_s29 + $0x7a0] sm:$0xff] }
  0xf8   : > { %1304 = vmatprep.subr.bf16.mxu1 %v1303_v19  ;;  %v524_v18 = vld [vmem:[%s1760_s29 + $0x7e0] sm:$0xff]  ;;  %v518_v19 = vld [vmem:[%s1760_s29 + $0x7b0] sm:$0xff] }
  0xf9   : > { %v1261_v21 = vpack.c.bf16 %v524_v18, %v516_v12  ;;  %v1325_v22 = vpack.c.bf16 %v526_v20, %v518_v19 }
  0xfa   : > { %1242 = vmatpush1.bf16.msra.mxu0 %v1241_v27  ;;  %v536_v27 = vsub.s32 1, %v1901_v13 }
  0xfb   : > { %1306 = vmatpush1.bf16.msra.mxu1 %v1305_v16  ;;  %1244 = vmatprep.subr.bf16.mxu0 %v1243_v30  ;;  %v544_v16 = vsub.s32 3, %v1901_v13 }
  0xfc   : > { %1308 = vmatprep.subr.bf16.mxu1 %v1307_v31  ;;  %v537_v30 = vrot.slane %v528_v26, %v536_v27 }
  0xfd   : > { %v545_v31 = vrot.slane %v528_v26, %v544_v16 }
  0xfe   : > { %1246 = vmatpush1.bf16.msra.mxu0 %v1245_v38 }
  0xff   : > { %1310 = vmatpush1.bf16.msra.mxu1 %v1309_v39  ;;  %1248 = vmatprep.subr.bf16.mxu0 %v1247_v42 }
 0x100   : > { %1312 = vmatprep.subr.bf16.mxu1 %v1311_v43 }
 0x102   : > { %1250 = vmatpush1.bf16.msra.mxu0 %v1249_v50  ;;  %v553_v50 = vrot.slane %v528_v26, %v552_v46 }
 0x103   : > { %1314 = vmatpush1.bf16.msra.mxu1 %v1313_v51  ;;  %1252 = vmatprep.subr.bf16.mxu0 %v1251_v54  ;;  %v561_v51 = vrot.slane %v528_v26, %v560_v47 }
 0x104   : > { %1316 = vmatprep.subr.bf16.mxu1 %v1315_v55 }
 0x106   : > { %1254 = vmatpush1.bf16.msra.mxu0 %v1253_v62 }
 0x107   : > { %1318 = vmatpush1.bf16.msra.mxu1 %v1317_v63  ;;  %1256 = vmatprep.subr.bf16.mxu0 %v1255_v2 }
 0x108   : > { %1320 = vmatprep.subr.bf16.mxu1 %v1319_v3 }
 0x10a   : > { %1258 = vmatpush1.bf16.msra.mxu0 %v1257_v10 }
 0x10b   : > { %1322 = vmatpush1.bf16.msra.mxu1 %v1321_v11  ;;  %1260 = vmatprep.subr.bf16.mxu0 %v1259_v14 }
 0x10c   : > { %1324 = vmatprep.subr.bf16.mxu1 %v1323_v17 }
 0x10e   : > { %1262 = vmatpush1.bf16.msra.mxu0 %v1261_v21 }
 0x10f   : > { %1326 = vmatpush1.bf16.msra.mxu1 %v1325_v22 }
 0x111   : > { %788 = vmatmul.mubr.f32.vlgmr.msra.gmra.mrb[2].mxu0 %v1913_v24 }
 0x112   : > { %859 = vmatmul.mubr.f32.vlgmr.msra.gmra.mrb[2].mxu1 %v1913_v24 }
 0x1a4   : > { %v647_v32 = vpop.f32.mrb[0].mxu0 }
 0x1a5   : > { %v718_v33 = vpop.f32.mrb[0].mxu1  ;;  %v648_v34 = vadd.f32 %v647_v32, %v533_v28  ;;  %v649_v35 = vpop.f32.mrb[1].mxu0 }
 0x1a6   : > { %v719_v24 = vadd.f32 %v718_v33, %v541_v29  ;;  %v720_v36 = vpop.f32.mrb[1].mxu1  ;;  %v650_v37 = vadd.f32 %v649_v35, %v537_v30 }
 0x1a7   : > { %v721_v38 = vadd.f32 %v720_v36, %v545_v31 }
 0x1a8   : > { %v873_v39 = vcombine.low %v648_v34, %v650_v37 }
 0x1a9   : > { %v874_v40 = vcombine.low %v719_v24, %v721_v38 }
 0x1aa   : > { %v881_v41 = vrot.slane %v873_v39, %v1904_v15 }
 0x1ab   : > { %v888_v42 = vrot.slane %v874_v40, %v1904_v15 }
 0x1ad   : > { %v889_v43 = vcombine.low %v881_v41, %v888_v42 }
 0x1af   : > { %909 = vst [vmem:[%s2048_s17] sm:$0xff] %v889_v43 }
 0x1e4   : > { %v789_v52 = vpop.f32.mrb[2].mxu0 }
 0x1e5   : > { %v860_v53 = vpop.f32.mrb[2].mxu1  ;;  %v790_v54 = vadd.f32 %v789_v52, %v549_v48  ;;  %v791_v56 = vpop.f32.mrb[3].mxu0 }
 0x1e6   : > { %v861_v55 = vadd.f32 %v860_v53, %v557_v49  ;;  %v862_v57 = vpop.f32.mrb[3].mxu1  ;;  %v792_v58 = vadd.f32 %v791_v56, %v553_v50 }
 0x1e7   : > { %v863_v59 = vadd.f32 %v862_v57, %v561_v51 }
 0x1e8   : > { %v890_v60 = vcombine.low %v790_v54, %v792_v58 }
 0x1e9   : > { %v891_v61 = vcombine.low %v861_v55, %v863_v59  ;;  %918 = sbr.rel (!%p2135_p5) target bundleno = 523 (0x20b), region = 48 }
 0x1ea   : > { %v898_v62 = vrot.slane %v890_v60, %v1904_v15 }
 0x1eb   : > { %v905_v13 = vrot.slane %v891_v61, %v1904_v15 }
 0x1ed   : > { %v906_v63 = vcombine.low %v898_v62, %v905_v13 }
 0x1ef   : > { %910 = vst [vmem:[%s2048_s17 + $0x8] sm:$0xff] %v906_v63 }
 0x1f0   : > { %s2147_s4 = smov (!%p921_p6, %s920_s4), 8 }
 0x1f1   : > { %s2062_s7 = sshll.u32 %s2147_s4, 5 }
 0x1f2   : > { %s925_s6 = ssub.s32 256, %s2062_s7 }
 0x1f3   : > { %926 = vsyncadd %s912_s27, %s925_s6  ;;  %p1060_p11 = scmp.ne.s32.totalorder %s2062_s7, 0  ;;  %s1070_s24 = sshll.u32 %s1589_s16, 8 }
 0x1f4   : > { %s2072_s28 = scalar_lea.hbm %s2118_s3, %s1070_s24  ;;  %s932_s22 = sshll.u32 %s2048_s17, 4  ;;  %s933_s22 = int_to_ptr.vmem [resolvable:$true] %s932_s22 }
 0x1f5   : > { %s1469_s5 = scalar_lea.vmem %s933_s22, %s2062_s7  ;;  %s1547_s19 = smov [#allocation8]  }
 0x1f6   : > { %p1470_p13 = scmp.ne.s32.totalorder %s933_s22, %s1469_s5  ;;  %s1473_s9 = sshll.u32 %s1547_s19, 4  ;;  %s1474_s9 = int_to_ptr.vmem [resolvable:$false] %s1473_s9 }
 0x1f7   : > { %s1475_s29 = scalar_lea.vmem %s1474_s9, 512  ;;  %p1476_p3 = scmp.lt.s32.totalorder %s933_s22, %s1474_s9 }
 0x1f8   : > { %p1471_p2 = pnand %p1470_p13, %p1060_p11  ;;  %p1477_p8 = scmp.lt.s32.totalorder %s1475_s29, %s1469_s5 }
 0x1fa   : > { %p1472_p12 = pneg %p1471_p2  ;;  %p1478_p9 = por %p1477_p8, %p1476_p3 }
 0x1fc   : > { %p1479_p1 = pnand %p1478_p9, %p1472_p12 }
 0x1fe   : > { %1482 = shalt.err (!%p1479_p1)
}
 0x1ff   : > { %s1483_s16 = scalar_lea.hbm %s2072_s28, %s2062_s7  ;;  %s1487_s11 = scalar_lea.hbm %s2118_s3, 384 }
 0x200   : > { %p1484_p10 = scmp.ne.s32.totalorder %s2072_s28, %s1483_s16  ;;  %p1488_p0 = scmp.lt.u32.totalorder %s2072_s28, %s2118_s3 }
 0x201   : > { %p1489_p5 = scmp.lt.u32.totalorder %s1487_s11, %s1483_s16  ;;  %p1491_p13 = scmp.lt.u32.totalorder %s1483_s16, %s2072_s28 }
 0x202   : > { %p1485_p7 = pnand %p1484_p10, %p1060_p11 }
 0x203   : > { %p1490_p6 = por %p1489_p5, %p1488_p0 }
 0x204   : > { %p1486_p4 = pneg %p1485_p7 }
 0x205   : > { %p1492_p2 = por %p1491_p13, %p1490_p6 }
 0x207   : > { %p1493_p12 = pnand %p1492_p2, %p1486_p4 }
 0x209   : > { %1496 = shalt.err (!%p1493_p12)
}
 0x20a   : > { %935 = dma.vmem_to_hbm [thread:$0]  (%p1060_p11), %s933_s22, %s2062_s7, %s2072_s28, %s912_s27  }
 0x20b PF: > { %s944_s4 = sand.u32 1, %s1527_s12   ;;  %p2136_p3 = scmp.ne.s32.totalorder %s2126_s25, 0 }
 0x20c   : > { %p2137_p8 = scmp.ge.s32.totalorder %s1539_s15, 2  ;;  %s945_s6 = scalar_lea.sflag [#allocation4], %s944_s4 }
 0x20e   : > { %p1339_p9 = pnand %p2137_p8, %p2136_p3 }
 0x210   : > { %1522 = dma.done.wait (!%p1339_p9), %s945_s6, 256  }
 0x211   : > { %1524 = vsyncadd (!%p1339_p9), %s945_s6, 4294967040  ;;  %p17_p1 = scmp.ge.s32.totalorder %s1593_s18, 4   ;;  %s2138_s12 = smov %s1531_s13 }
 0x212   : > { %s2139_s13 = smov %s1535_s14  ;;  %s2140_s14 = smov %s1605_s21 }
 0x213   : > { %s2141_s15 = smov %s1593_s18  ;;  %19 = sbr.rel (!%p17_p1) target bundleno = 6 (0x6), region = 93 }
 0x21a   :  { %950 = vsyncpa [#allocation3], 1 }
 0x21b   :  { %952 = vsyncpa [#allocation3 + $0x1], 1 }
 0x21c   :  { %953 = vsyncpa [#allocation6], 1 }
 0x21d   :  { %955 = vsyncpa [#allocation6 + $0x1], 1 }
 0x21e   :  { %956 = vsyncpa [#allocation4], 1 }
 0x21f   :  { %958 = vsyncpa [#allocation4 + $0x1], 1 }

</bundles_post_ra>
